<compile_context>
chip_gen: v7x
topology: tpu7x:2x2x1
jax: 0.10.0
libtpu: 0.0.40
codegen_flags: <defaults>
</compile_context>

<pallas_src>
import math
import functools

import jax
import jax.numpy as jnp
from jax import lax
from jax.experimental import pallas as pl
from jax.experimental.pallas import tpu as pltpu


# ------------------------------------------------------------------
# Fused MHA kernel: one grid step = one (batch, q-tile) block.
# ------------------------------------------------------------------
def _fused_mha_kernel(q_ref, k_ref, v_ref,
                      wq_ref, wk_ref, wv_ref, wo_ref,
                      bq_ref, bk_ref, bv_ref, bo_ref,
                      o_ref,
                      kproj_ref, vproj_ref, ctx_ref,
                      *, h, d_k, scale, matmul_dtype):
    f32 = jnp.float32

    def project(x, w_ref, b_ref):
        # MXU matmul in `matmul_dtype` with f32 accumulation; f32 bias add.
        y = jnp.dot(x.astype(matmul_dtype), w_ref[...],
                    preferred_element_type=f32)
        return y + b_ref[...]                      # (1, D) bias broadcasts

    # ---- K/V projections: once per batch, cached in VMEM scratch ----------
    # The q-tile grid axis is "arbitrary", so for every batch the j == 0 step
    # runs first on whichever core owns that batch; later q tiles reuse the
    # projected (already matmul_dtype-cast) K/V slabs.
    @pl.when(pl.program_id(1) == 0)
    def _():
        kproj_ref[...] = project(k_ref[0], wk_ref, bk_ref).astype(matmul_dtype)
        vproj_ref[...] = project(v_ref[0], wv_ref, bv_ref).astype(matmul_dtype)

    # ---- Q projection, 1/sqrt(d_k) folded in once, single cast ------------
    q = (project(q_ref[0], wq_ref, bq_ref) * scale).astype(matmul_dtype)
    k = kproj_ref[...]                             # [S_kv, D] matmul_dtype
    v = vproj_ref[...]                             # [S_kv, D] matmul_dtype

    # ---- per-head attention (h is static -> unrolled at trace time) -------
    # Contract the LAST axis of both operands: no XLU transpose of K.
    dn = (((1,), (1,)), ((), ()))
    for head in range(h):
        sl = slice(head * d_k, (head + 1) * d_k)
        s = lax.dot_general(q[:, sl], k[:, sl], dimension_numbers=dn,
                            preferred_element_type=f32)          # [TQ, S_kv]
        m = jnp.max(s, axis=-1, keepdims=True)                   # f32 stats
        e = jnp.exp(s - m)
        denom = jnp.sum(e, axis=-1, keepdims=True)
        # Deferred normalization: scale the [TQ, d_k] context instead of the
        # [TQ, S_kv] probabilities; the divide uses the otherwise-idle EUP.
        ctx_h = jnp.dot(e.astype(matmul_dtype), v[:, sl],
                        preferred_element_type=f32)               # [TQ, d_k]
        ctx_ref[:, sl] = ctx_h * pl.reciprocal(denom, approx=True)

    # ---- output projection; full-width lane-dense store --------------------
    out = jnp.dot(ctx_ref[...].astype(matmul_dtype), wo_ref[...],
                  preferred_element_type=f32) + bo_ref[...]
    o_ref[0] = out.astype(o_ref.dtype)


# ------------------------------------------------------------------
# Wrapper: grid / BlockSpecs / scratch, per-chip VMEM limit.
# ------------------------------------------------------------------
def _vmem_limit_bytes():
    """~3/4 of the chip's physical VMEM, capped at 100 MiB.
    ~96 MiB on v5e/v6e (128 MiB physical), ~48 MiB on v7x (64 MiB)."""
    cap = 128 * 1024 * 1024
    try:
        cap = int(getattr(pltpu.get_tpu_info(), "vmem_capacity_bytes", cap))
    except Exception:
        pass
    return int(min(cap * 3 // 4, 100 * 1024 * 1024))


def multi_head_attention(query, key, value, params, h, *,
                         q_tile=None, matmul_dtype=jnp.float32):
    """query: [B, Sq, D]; key/value: [B, Skv, D]; returns [B, Sq, D]."""
    b, s_q, d = query.shape
    _, s_kv, _ = key.shape
    assert value.shape == key.shape
    assert d % h == 0
    d_k = d // h

    # Default 256-row q tiles (fills the v6e/v7x 256-wide MXU), clamped to the
    # full (short) sequence.
    tq = min(256 if q_tile is None else q_tile, s_q)
    assert s_q % tq == 0 and (tq % 8 == 0 or tq == s_q)
    scale = 1.0 / math.sqrt(d_k)

    kernel = functools.partial(_fused_mha_kernel, h=h, d_k=d_k, scale=scale,
                               matmul_dtype=matmul_dtype)

    # Batch axis "parallel" (megacore-shardable, >=2 iterations when B >= 2);
    # q-tile axis "arbitrary" so the per-batch K/V cache is valid.
    grid = (b, s_q // tq)

    q_spec = pl.BlockSpec((1, tq, d), lambda i, j: (i, j, 0))
    kv_spec = pl.BlockSpec((1, s_kv, d), lambda i, j: (i, 0, 0))
    w_spec = pl.BlockSpec((d, d), lambda i, j: (0, 0))
    b_spec = pl.BlockSpec((1, d), lambda i, j: (0, 0))
    o_spec = pl.BlockSpec((1, tq, d), lambda i, j: (i, j, 0))

    # Weights enter already in the MXU dtype (halves weight HBM DMA and VMEM
    # residency in bf16 mode); biases stay f32 (added to f32 accumulators).
    # Activations keep their input dtype and are cast once inside the kernel.
    wq = params["wq"].astype(matmul_dtype)
    wk = params["wk"].astype(matmul_dtype)
    wv = params["wv"].astype(matmul_dtype)
    wo = params["wo"].astype(matmul_dtype)
    bq = params["bq"].astype(jnp.float32).reshape(1, d)
    bk = params["bk"].astype(jnp.float32).reshape(1, d)
    bv = params["bv"].astype(jnp.float32).reshape(1, d)
    bo = params["bo"].astype(jnp.float32).reshape(1, d)

    # Advisory cost estimate (K/V projections happen once per batch).
    flops = b * (4 * s_q * d * d + 4 * s_kv * d * d + 4 * s_q * s_kv * d)
    transcendentals = b * h * s_q * s_kv + b * h * s_q
    bytes_accessed = (4 * (2 * b * s_q * d + 2 * b * s_kv * d + 4 * d)
                      + 4 * d * d * jnp.dtype(matmul_dtype).itemsize)

    scratch_shapes = [
        pltpu.VMEM((s_kv, d), matmul_dtype),   # projected K (cached per batch)
        pltpu.VMEM((s_kv, d), matmul_dtype),   # projected V (cached per batch)
        pltpu.VMEM((tq, d), jnp.float32),      # lane-dense context slab
    ]

    return pl.pallas_call(
        kernel,
        out_shape=jax.ShapeDtypeStruct((b, s_q, d), query.dtype),
        grid=grid,
        in_specs=[q_spec, kv_spec, kv_spec,
                  w_spec, w_spec, w_spec, w_spec,
                  b_spec, b_spec, b_spec, b_spec],
        out_specs=o_spec,
        scratch_shapes=scratch_shapes,
        compiler_params=pltpu.CompilerParams(
            dimension_semantics=("parallel", "arbitrary"),
            vmem_limit_bytes=_vmem_limit_bytes()),
        cost_estimate=pl.CostEstimate(flops=int(flops),
                                      transcendentals=int(transcendentals),
                                      bytes_accessed=int(bytes_accessed)),
    )(query, key, value, wq, wk, wv, wo, bq, bk, bv, bo)


# ------------------------------------------------------------------
# Pure-JAX reference (for correctness check)
# ------------------------------------------------------------------
def reference_mha(query, key, value, params, h):
    b, s_q, d = query.shape
    d_k = d // h

    def project(x, w, bias):
        y = x @ w + bias
        return y.reshape(b, -1, h, d_k).transpose(0, 2, 1, 3)

    q = project(query, params["wq"], params["bq"])
    k = project(key,   params["wk"], params["bk"])
    v = project(value, params["wv"], params["bv"])
    s = jnp.einsum("bhqd,bhkd->bhqk", q, k) / math.sqrt(d_k)
    p = jax.nn.softmax(s, axis=-1)
    ctx = jnp.einsum("bhqk,bhkd->bhqd", p, v)
    ctx = ctx.transpose(0, 2, 1, 3).reshape(b, s_q, d)
    return ctx @ params["wo"] + params["bo"]


if __name__ == "__main__":
    B, S, D, H = 2, 8, 32, 4   # batch, seq, d_model, heads (d_k = 8)

    key0 = jax.random.PRNGKey(0)
    keys = jax.random.split(key0, 11)
    wscale = 1.0 / math.sqrt(D)

    params = {
        "wq": jax.random.normal(keys[0], (D, D), jnp.float32) * wscale,
        "bq": jax.random.normal(keys[1], (D,), jnp.float32) * 0.01,
        "wk": jax.random.normal(keys[2], (D, D), jnp.float32) * wscale,
        "bk": jax.random.normal(keys[3], (D,), jnp.float32) * 0.01,
        "wv": jax.random.normal(keys[4], (D, D), jnp.float32) * wscale,
        "bv": jax.random.normal(keys[5], (D,), jnp.float32) * 0.01,
        "wo": jax.random.normal(keys[6], (D, D), jnp.float32) * wscale,
        "bo": jax.random.normal(keys[7], (D,), jnp.float32) * 0.01,
    }

    query = jax.random.normal(keys[8], (B, S, D), jnp.float32)
    key_t = jax.random.normal(keys[9], (B, S, D), jnp.float32)
    value = jax.random.normal(keys[10], (B, S, D), jnp.float32)

    ref = reference_mha(query, key_t, value, params, H)

    # f32 MXU operands (v5e-friendly path; all elementwise math is f32).
    out = multi_head_attention(query, key_t, value, params, H)
    out = jax.block_until_ready(out)
    assert out.shape == (B, S, D)
    assert jnp.allclose(out, ref, atol=5e-3, rtol=5e-3), "f32 path mismatch"

    # bf16 MXU operands / bf16 weights at the call boundary (v6e/v7x path);
    # softmax statistics and accumulation stay f32.
    out_bf16 = multi_head_attention(query, key_t, value, params, H,
                                    matmul_dtype=jnp.bfloat16)
    out_bf16 = jax.block_until_ready(out_bf16)
    assert jnp.allclose(out_bf16, ref, atol=6e-2, rtol=6e-2), "bf16 path mismatch"

    print("KERNEL_OK")
</pallas_src>

<mosaic_0001>
module attributes {stable_mosaic.version = 11 : i64} {
  func.func @_fused_mha_kernel(%arg0: i32, %arg1: i32, %arg2: memref<1x8x32xf32, #tpu.memory_space<vmem>>, %arg3: memref<1x8x32xf32, #tpu.memory_space<vmem>>, %arg4: memref<1x8x32xf32, #tpu.memory_space<vmem>>, %arg5: memref<32x32xf32, #tpu.memory_space<vmem>>, %arg6: memref<32x32xf32, #tpu.memory_space<vmem>>, %arg7: memref<32x32xf32, #tpu.memory_space<vmem>>, %arg8: memref<32x32xf32, #tpu.memory_space<vmem>>, %arg9: memref<1x32xf32, #tpu.memory_space<vmem>>, %arg10: memref<1x32xf32, #tpu.memory_space<vmem>>, %arg11: memref<1x32xf32, #tpu.memory_space<vmem>>, %arg12: memref<1x32xf32, #tpu.memory_space<vmem>>, %arg13: memref<1x8x32xf32, #tpu.memory_space<vmem>>, %arg14: memref<8x32xf32, #tpu.memory_space<vmem>>, %arg15: memref<8x32xf32, #tpu.memory_space<vmem>>, %arg16: memref<8x32xf32, #tpu.memory_space<vmem>>) attributes {dimension_semantics = [#tpu.dimension_semantics<parallel>, #tpu.dimension_semantics<arbitrary>], iteration_bounds = array<i64: 2, 1>, scalar_prefetch = 0 : i64, scratch_operands = 3 : i64, tpu.core_type = #tpu.core_type<tc>, window_params = [{transform_indices = @transform_0, window_bounds = array<i64: 1, 8, 32>}, {transform_indices = @transform_1, window_bounds = array<i64: 1, 8, 32>}, {transform_indices = @transform_2, window_bounds = array<i64: 1, 8, 32>}, {pipeline_mode = #tpu.pipeline_mode<synchronous>, transform_indices = @transform_3, window_bounds = array<i64: 32, 32>}, {pipeline_mode = #tpu.pipeline_mode<synchronous>, transform_indices = @transform_4, window_bounds = array<i64: 32, 32>}, {pipeline_mode = #tpu.pipeline_mode<synchronous>, transform_indices = @transform_5, window_bounds = array<i64: 32, 32>}, {pipeline_mode = #tpu.pipeline_mode<synchronous>, transform_indices = @transform_6, window_bounds = array<i64: 32, 32>}, {pipeline_mode = #tpu.pipeline_mode<synchronous>, transform_indices = @transform_7, window_bounds = array<i64: 1, 32>}, {pipeline_mode = #tpu.pipeline_mode<synchronous>, transform_indices = @transform_8, window_bounds = array<i64: 1, 32>}, {pipeline_mode = #tpu.pipeline_mode<synchronous>, transform_indices = @transform_9, window_bounds = array<i64: 1, 32>}, {pipeline_mode = #tpu.pipeline_mode<synchronous>, transform_indices = @transform_10, window_bounds = array<i64: 1, 32>}, {transform_indices = @transform_11, window_bounds = array<i64: 1, 8, 32>}]} {
    %c0_i32 = arith.constant 0 : i32
    %0 = arith.cmpi eq, %arg1, %c0_i32 : i32
    %1 = arith.extui %0 : i1 to i32
    %c0_i32_0 = arith.constant 0 : i32
    %2 = arith.cmpi ne, %1, %c0_i32_0 : i32
    scf.if %2 {
      %c0_43 = arith.constant 0 : index
      %c0_44 = arith.constant 0 : index
      %c0_45 = arith.constant 0 : index
      %87 = vector.load %arg3[%c0_43, %c0_44, %c0_45] : memref<1x8x32xf32, #tpu.memory_space<vmem>>, vector<1x8x32xf32>
      %88 = vector.shape_cast %87 : vector<1x8x32xf32> to vector<8x32xf32>
      %c0_46 = arith.constant 0 : index
      %c0_47 = arith.constant 0 : index
      %89 = vector.load %arg6[%c0_46, %c0_47] : memref<32x32xf32, #tpu.memory_space<vmem>>, vector<32x32xf32>
      %cst_48 = arith.constant dense<0.000000e+00> : vector<8x32xf32>
      %90 = tpu.matmul %88, %89, %cst_48 {dimension_numbers = #tpu.dot_dimension_numbers<[1], [0], [0], [1], [0, 0, 1, 1], [], []>} : vector<8x32xf32>, vector<32x32xf32>, vector<8x32xf32> -> vector<8x32xf32>
      %c0_49 = arith.constant 0 : index
      %c0_50 = arith.constant 0 : index
      %91 = vector.load %arg10[%c0_49, %c0_50] : memref<1x32xf32, #tpu.memory_space<vmem>>, vector<1x32xf32>
      %92 = vector.broadcast %91 : vector<1x32xf32> to vector<8x32xf32>
      %93 = arith.addf %90, %92 : vector<8x32xf32>
      %c0_51 = arith.constant 0 : index
      %c0_52 = arith.constant 0 : index
      %94 = vector.load %arg14[%c0_51, %c0_52] : memref<8x32xf32, #tpu.memory_space<vmem>>, vector<8x32xf32>
      tpu.vector_store %arg14[%c0_51, %c0_52], %93 {strides = array<i32>} : memref<8x32xf32, #tpu.memory_space<vmem>>, vector<8x32xf32>,
      %c0_53 = arith.constant 0 : index
      %c0_54 = arith.constant 0 : index
      %c0_55 = arith.constant 0 : index
      %95 = vector.load %arg4[%c0_53, %c0_54, %c0_55] : memref<1x8x32xf32, #tpu.memory_space<vmem>>, vector<1x8x32xf32>
      %96 = vector.shape_cast %95 : vector<1x8x32xf32> to vector<8x32xf32>
      %c0_56 = arith.constant 0 : index
      %c0_57 = arith.constant 0 : index
      %97 = vector.load %arg7[%c0_56, %c0_57] : memref<32x32xf32, #tpu.memory_space<vmem>>, vector<32x32xf32>
      %cst_58 = arith.constant dense<0.000000e+00> : vector<8x32xf32>
      %98 = tpu.matmul %96, %97, %cst_58 {dimension_numbers = #tpu.dot_dimension_numbers<[1], [0], [0], [1], [0, 0, 1, 1], [], []>} : vector<8x32xf32>, vector<32x32xf32>, vector<8x32xf32> -> vector<8x32xf32>
      %c0_59 = arith.constant 0 : index
      %c0_60 = arith.constant 0 : index
      %99 = vector.load %arg11[%c0_59, %c0_60] : memref<1x32xf32, #tpu.memory_space<vmem>>, vector<1x32xf32>
      %100 = vector.broadcast %99 : vector<1x32xf32> to vector<8x32xf32>
      %101 = arith.addf %98, %100 : vector<8x32xf32>
      %c0_61 = arith.constant 0 : index
      %c0_62 = arith.constant 0 : index
      %102 = vector.load %arg15[%c0_61, %c0_62] : memref<8x32xf32, #tpu.memory_space<vmem>>, vector<8x32xf32>
      tpu.vector_store %arg15[%c0_61, %c0_62], %101 {strides = array<i32>} : memref<8x32xf32, #tpu.memory_space<vmem>>, vector<8x32xf32>,
    } else {
    }
    %c0 = arith.constant 0 : index
    %c0_1 = arith.constant 0 : index
    %c0_2 = arith.constant 0 : index
    %3 = vector.load %arg2[%c0, %c0_1, %c0_2] : memref<1x8x32xf32, #tpu.memory_space<vmem>>, vector<1x8x32xf32>
    %4 = vector.shape_cast %3 : vector<1x8x32xf32> to vector<8x32xf32>
    %c0_3 = arith.constant 0 : index
    %c0_4 = arith.constant 0 : index
    %5 = vector.load %arg5[%c0_3, %c0_4] : memref<32x32xf32, #tpu.memory_space<vmem>>, vector<32x32xf32>
    %cst = arith.constant dense<0.000000e+00> : vector<8x32xf32>
    %6 = tpu.matmul %4, %5, %cst {dimension_numbers = #tpu.dot_dimension_numbers<[1], [0], [0], [1], [0, 0, 1, 1], [], []>} : vector<8x32xf32>, vector<32x32xf32>, vector<8x32xf32> -> vector<8x32xf32>
    %c0_5 = arith.constant 0 : index
    %c0_6 = arith.constant 0 : index
    %7 = vector.load %arg9[%c0_5, %c0_6] : memref<1x32xf32, #tpu.memory_space<vmem>>, vector<1x32xf32>
    %8 = vector.broadcast %7 : vector<1x32xf32> to vector<8x32xf32>
    %9 = arith.addf %6, %8 : vector<8x32xf32>
    %cst_7 = arith.constant 0.353553385 : f32
    %10 = vector.broadcast %cst_7 : f32 to vector<8x32xf32>
    %11 = arith.mulf %9, %10 : vector<8x32xf32>
    %c0_8 = arith.constant 0 : index
    %c0_9 = arith.constant 0 : index
    %12 = vector.load %arg14[%c0_8, %c0_9] : memref<8x32xf32, #tpu.memory_space<vmem>>, vector<8x32xf32>
    %c0_10 = arith.constant 0 : index
    %c0_11 = arith.constant 0 : index
    %13 = vector.load %arg15[%c0_10, %c0_11] : memref<8x32xf32, #tpu.memory_space<vmem>>, vector<8x32xf32>
    %14 = vector.extract_strided_slice %11 {offsets = [0, 0], sizes = [8, 8], strides = [1, 1]} : vector<8x32xf32> to vector<8x8xf32>
    %15 = vector.extract_strided_slice %12 {offsets = [0, 0], sizes = [8, 8], strides = [1, 1]} : vector<8x32xf32> to vector<8x8xf32>
    %cst_12 = arith.constant dense<0.000000e+00> : vector<8x8xf32>
    %16 = tpu.matmul %14, %15, %cst_12 {dimension_numbers = #tpu.dot_dimension_numbers<[1], [1], [0], [0], [0, 0, 1, 0], [], []>} : vector<8x8xf32>, vector<8x8xf32>, vector<8x8xf32> -> vector<8x8xf32>
    %cst_13 = arith.constant dense<0xFF800000> : vector<8xf32>
    %17 = vector.multi_reduction <maximumf>, %16, %cst_13 [1] : vector<8x8xf32> to vector<8xf32>
    %18 = vector.shape_cast %17 : vector<8xf32> to vector<8x1xf32>
    %19 = vector.broadcast %18 : vector<8x1xf32> to vector<8x8xf32>
    %20 = arith.subf %16, %19 : vector<8x8xf32>
    %21 = math.exp %20 : vector<8x8xf32>
    %cst_14 = arith.constant dense<0.000000e+00> : vector<8xf32>
    %22 = vector.multi_reduction <add>, %21, %cst_14 [1] : vector<8x8xf32> to vector<8xf32>
    %23 = vector.shape_cast %22 : vector<8xf32> to vector<8x1xf32>
    %24 = vector.extract_strided_slice %13 {offsets = [0, 0], sizes = [8, 8], strides = [1, 1]} : vector<8x32xf32> to vector<8x8xf32>
    %cst_15 = arith.constant dense<0.000000e+00> : vector<8x8xf32>
    %25 = tpu.matmul %21, %24, %cst_15 {dimension_numbers = #tpu.dot_dimension_numbers<[1], [0], [0], [1], [0, 0, 1, 1], [], []>} : vector<8x8xf32>, vector<8x8xf32>, vector<8x8xf32> -> vector<8x8xf32>
    %26 = tpu.reciprocal %23 {approx = true} : vector<8x1xf32> -> vector<8x1xf32>
    %27 = vector.broadcast %26 : vector<8x1xf32> to vector<8x8xf32>
    %28 = arith.mulf %25, %27 : vector<8x8xf32>
    %c0_16 = arith.constant 0 : index
    %c0_17 = arith.constant 0 : index
    %29 = vector.load %arg16[%c0_16, %c0_17] : memref<8x32xf32, #tpu.memory_space<vmem>>, vector<8x8xf32>
    tpu.vector_store %arg16[%c0_16, %c0_17], %28 {strides = array<i32>} : memref<8x32xf32, #tpu.memory_space<vmem>>, vector<8x8xf32>,
    %30 = vector.extract_strided_slice %11 {offsets = [0, 8], sizes = [8, 8], strides = [1, 1]} : vector<8x32xf32> to vector<8x8xf32>
    %31 = vector.extract_strided_slice %12 {offsets = [0, 8], sizes = [8, 8], strides = [1, 1]} : vector<8x32xf32> to vector<8x8xf32>
    %cst_18 = arith.constant dense<0.000000e+00> : vector<8x8xf32>
    %32 = tpu.matmul %30, %31, %cst_18 {dimension_numbers = #tpu.dot_dimension_numbers<[1], [1], [0], [0], [0, 0, 1, 0], [], []>} : vector<8x8xf32>, vector<8x8xf32>, vector<8x8xf32> -> vector<8x8xf32>
    %cst_19 = arith.constant dense<0xFF800000> : vector<8xf32>
    %33 = vector.multi_reduction <maximumf>, %32, %cst_19 [1] : vector<8x8xf32> to vector<8xf32>
    %34 = vector.shape_cast %33 : vector<8xf32> to vector<8x1xf32>
    %35 = vector.broadcast %34 : vector<8x1xf32> to vector<8x8xf32>
    %36 = arith.subf %32, %35 : vector<8x8xf32>
    %37 = math.exp %36 : vector<8x8xf32>
    %cst_20 = arith.constant dense<0.000000e+00> : vector<8xf32>
    %38 = vector.multi_reduction <add>, %37, %cst_20 [1] : vector<8x8xf32> to vector<8xf32>
    %39 = vector.shape_cast %38 : vector<8xf32> to vector<8x1xf32>
    %40 = vector.extract_strided_slice %13 {offsets = [0, 8], sizes = [8, 8], strides = [1, 1]} : vector<8x32xf32> to vector<8x8xf32>
    %cst_21 = arith.constant dense<0.000000e+00> : vector<8x8xf32>
    %41 = tpu.matmul %37, %40, %cst_21 {dimension_numbers = #tpu.dot_dimension_numbers<[1], [0], [0], [1], [0, 0, 1, 1], [], []>} : vector<8x8xf32>, vector<8x8xf32>, vector<8x8xf32> -> vector<8x8xf32>
    %42 = tpu.reciprocal %39 {approx = true} : vector<8x1xf32> -> vector<8x1xf32>
    %43 = vector.broadcast %42 : vector<8x1xf32> to vector<8x8xf32>
    %44 = arith.mulf %41, %43 : vector<8x8xf32>
    %c0_22 = arith.constant 0 : index
    %c8 = arith.constant 8 : index
    %45 = vector.load %arg16[%c0_22, %c8] : memref<8x32xf32, #tpu.memory_space<vmem>>, vector<8x8xf32>
    tpu.vector_store %arg16[%c0_22, %c8], %44 {strides = array<i32>} : memref<8x32xf32, #tpu.memory_space<vmem>>, vector<8x8xf32>,
    %46 = vector.extract_strided_slice %11 {offsets = [0, 16], sizes = [8, 8], strides = [1, 1]} : vector<8x32xf32> to vector<8x8xf32>
    %47 = vector.extract_strided_slice %12 {offsets = [0, 16], sizes = [8, 8], strides = [1, 1]} : vector<8x32xf32> to vector<8x8xf32>
    %cst_23 = arith.constant dense<0.000000e+00> : vector<8x8xf32>
    %48 = tpu.matmul %46, %47, %cst_23 {dimension_numbers = #tpu.dot_dimension_numbers<[1], [1], [0], [0], [0, 0, 1, 0], [], []>} : vector<8x8xf32>, vector<8x8xf32>, vector<8x8xf32> -> vector<8x8xf32>
    %cst_24 = arith.constant dense<0xFF800000> : vector<8xf32>
    %49 = vector.multi_reduction <maximumf>, %48, %cst_24 [1] : vector<8x8xf32> to vector<8xf32>
    %50 = vector.shape_cast %49 : vector<8xf32> to vector<8x1xf32>
    %51 = vector.broadcast %50 : vector<8x1xf32> to vector<8x8xf32>
    %52 = arith.subf %48, %51 : vector<8x8xf32>
    %53 = math.exp %52 : vector<8x8xf32>
    %cst_25 = arith.constant dense<0.000000e+00> : vector<8xf32>
    %54 = vector.multi_reduction <add>, %53, %cst_25 [1] : vector<8x8xf32> to vector<8xf32>
    %55 = vector.shape_cast %54 : vector<8xf32> to vector<8x1xf32>
    %56 = vector.extract_strided_slice %13 {offsets = [0, 16], sizes = [8, 8], strides = [1, 1]} : vector<8x32xf32> to vector<8x8xf32>
    %cst_26 = arith.constant dense<0.000000e+00> : vector<8x8xf32>
    %57 = tpu.matmul %53, %56, %cst_26 {dimension_numbers = #tpu.dot_dimension_numbers<[1], [0], [0], [1], [0, 0, 1, 1], [], []>} : vector<8x8xf32>, vector<8x8xf32>, vector<8x8xf32> -> vector<8x8xf32>
    %58 = tpu.reciprocal %55 {approx = true} : vector<8x1xf32> -> vector<8x1xf32>
    %59 = vector.broadcast %58 : vector<8x1xf32> to vector<8x8xf32>
    %60 = arith.mulf %57, %59 : vector<8x8xf32>
    %c0_27 = arith.constant 0 : index
    %c16 = arith.constant 16 : index
    %61 = vector.load %arg16[%c0_27, %c16] : memref<8x32xf32, #tpu.memory_space<vmem>>, vector<8x8xf32>
    tpu.vector_store %arg16[%c0_27, %c16], %60 {strides = array<i32>} : memref<8x32xf32, #tpu.memory_space<vmem>>, vector<8x8xf32>,
    %62 = vector.extract_strided_slice %11 {offsets = [0, 24], sizes = [8, 8], strides = [1, 1]} : vector<8x32xf32> to vector<8x8xf32>
    %63 = vector.extract_strided_slice %12 {offsets = [0, 24], sizes = [8, 8], strides = [1, 1]} : vector<8x32xf32> to vector<8x8xf32>
    %cst_28 = arith.constant dense<0.000000e+00> : vector<8x8xf32>
    %64 = tpu.matmul %62, %63, %cst_28 {dimension_numbers = #tpu.dot_dimension_numbers<[1], [1], [0], [0], [0, 0, 1, 0], [], []>} : vector<8x8xf32>, vector<8x8xf32>, vector<8x8xf32> -> vector<8x8xf32>
    %cst_29 = arith.constant dense<0xFF800000> : vector<8xf32>
    %65 = vector.multi_reduction <maximumf>, %64, %cst_29 [1] : vector<8x8xf32> to vector<8xf32>
    %66 = vector.shape_cast %65 : vector<8xf32> to vector<8x1xf32>
    %67 = vector.broadcast %66 : vector<8x1xf32> to vector<8x8xf32>
    %68 = arith.subf %64, %67 : vector<8x8xf32>
    %69 = math.exp %68 : vector<8x8xf32>
    %cst_30 = arith.constant dense<0.000000e+00> : vector<8xf32>
    %70 = vector.multi_reduction <add>, %69, %cst_30 [1] : vector<8x8xf32> to vector<8xf32>
    %71 = vector.shape_cast %70 : vector<8xf32> to vector<8x1xf32>
    %72 = vector.extract_strided_slice %13 {offsets = [0, 24], sizes = [8, 8], strides = [1, 1]} : vector<8x32xf32> to vector<8x8xf32>
    %cst_31 = arith.constant dense<0.000000e+00> : vector<8x8xf32>
    %73 = tpu.matmul %69, %72, %cst_31 {dimension_numbers = #tpu.dot_dimension_numbers<[1], [0], [0], [1], [0, 0, 1, 1], [], []>} : vector<8x8xf32>, vector<8x8xf32>, vector<8x8xf32> -> vector<8x8xf32>
    %74 = tpu.reciprocal %71 {approx = true} : vector<8x1xf32> -> vector<8x1xf32>
    %75 = vector.broadcast %74 : vector<8x1xf32> to vector<8x8xf32>
    %76 = arith.mulf %73, %75 : vector<8x8xf32>
    %c0_32 = arith.constant 0 : index
    %c24 = arith.constant 24 : index
    %77 = vector.load %arg16[%c0_32, %c24] : memref<8x32xf32, #tpu.memory_space<vmem>>, vector<8x8xf32>
    tpu.vector_store %arg16[%c0_32, %c24], %76 {strides = array<i32>} : memref<8x32xf32, #tpu.memory_space<vmem>>, vector<8x8xf32>,
    %c0_33 = arith.constant 0 : index
    %c0_34 = arith.constant 0 : index
    %78 = vector.load %arg16[%c0_33, %c0_34] : memref<8x32xf32, #tpu.memory_space<vmem>>, vector<8x32xf32>
    %c0_35 = arith.constant 0 : index
    %c0_36 = arith.constant 0 : index
    %79 = vector.load %arg8[%c0_35, %c0_36] : memref<32x32xf32, #tpu.memory_space<vmem>>, vector<32x32xf32>
    %cst_37 = arith.constant dense<0.000000e+00> : vector<8x32xf32>
    %80 = tpu.matmul %78, %79, %cst_37 {dimension_numbers = #tpu.dot_dimension_numbers<[1], [0], [0], [1], [0, 0, 1, 1], [], []>} : vector<8x32xf32>, vector<32x32xf32>, vector<8x32xf32> -> vector<8x32xf32>
    %c0_38 = arith.constant 0 : index
    %c0_39 = arith.constant 0 : index
    %81 = vector.load %arg12[%c0_38, %c0_39] : memref<1x32xf32, #tpu.memory_space<vmem>>, vector<1x32xf32>
    %82 = vector.broadcast %81 : vector<1x32xf32> to vector<8x32xf32>
    %83 = arith.addf %80, %82 : vector<8x32xf32>
    %c0_40 = arith.constant 0 : index
    %c0_41 = arith.constant 0 : index
    %c0_42 = arith.constant 0 : index
    %84 = vector.load %arg13[%c0_40, %c0_41, %c0_42] : memref<1x8x32xf32, #tpu.memory_space<vmem>>, vector<1x8x32xf32>
    %85 = vector.shape_cast %84 : vector<1x8x32xf32> to vector<8x32xf32>
    %86 = vector.shape_cast %83 : vector<8x32xf32> to vector<1x8x32xf32>
    tpu.vector_store %arg13[%c0_40, %c0_41, %c0_42], %86 {strides = array<i32>} : memref<1x8x32xf32, #tpu.memory_space<vmem>>, vector<1x8x32xf32>,
    return
  }
  func.func @transform_0(%arg0: i32, %arg1: i32) -> (i32, i32, i32) {
    %c0_i32 = arith.constant 0 : i32
    %c0_i32_0 = arith.constant 0 : i32
    return %arg0, %arg1, %c0_i32 : i32, i32, i32
  }
  func.func @transform_1(%arg0: i32, %arg1: i32) -> (i32, i32, i32) {
    %c0_i32 = arith.constant 0 : i32
    %c0_i32_0 = arith.constant 0 : i32
    %c0_i32_1 = arith.constant 0 : i32
    return %arg0, %c0_i32, %c0_i32_0 : i32, i32, i32
  }
  func.func @transform_2(%arg0: i32, %arg1: i32) -> (i32, i32, i32) {
    %c0_i32 = arith.constant 0 : i32
    %c0_i32_0 = arith.constant 0 : i32
    %c0_i32_1 = arith.constant 0 : i32
    return %arg0, %c0_i32, %c0_i32_0 : i32, i32, i32
  }
  func.func @transform_3(%arg0: i32, %arg1: i32) -> (i32, i32) {
    %c0_i32 = arith.constant 0 : i32
    %c0_i32_0 = arith.constant 0 : i32
    %c0_i32_1 = arith.constant 0 : i32
    return %c0_i32, %c0_i32_0 : i32, i32
  }
  func.func @transform_4(%arg0: i32, %arg1: i32) -> (i32, i32) {
    %c0_i32 = arith.constant 0 : i32
    %c0_i32_0 = arith.constant 0 : i32
    %c0_i32_1 = arith.constant 0 : i32
    return %c0_i32, %c0_i32_0 : i32, i32
  }
  func.func @transform_5(%arg0: i32, %arg1: i32) -> (i32, i32) {
    %c0_i32 = arith.constant 0 : i32
    %c0_i32_0 = arith.constant 0 : i32
    %c0_i32_1 = arith.constant 0 : i32
    return %c0_i32, %c0_i32_0 : i32, i32
  }
  func.func @transform_6(%arg0: i32, %arg1: i32) -> (i32, i32) {
    %c0_i32 = arith.constant 0 : i32
    %c0_i32_0 = arith.constant 0 : i32
    %c0_i32_1 = arith.constant 0 : i32
    return %c0_i32, %c0_i32_0 : i32, i32
  }
  func.func @transform_7(%arg0: i32, %arg1: i32) -> (i32, i32) {
    %c0_i32 = arith.constant 0 : i32
    %c0_i32_0 = arith.constant 0 : i32
    %c0_i32_1 = arith.constant 0 : i32
    return %c0_i32, %c0_i32_0 : i32, i32
  }
  func.func @transform_8(%arg0: i32, %arg1: i32) -> (i32, i32) {
    %c0_i32 = arith.constant 0 : i32
    %c0_i32_0 = arith.constant 0 : i32
    %c0_i32_1 = arith.constant 0 : i32
    return %c0_i32, %c0_i32_0 : i32, i32
  }
  func.func @transform_9(%arg0: i32, %arg1: i32) -> (i32, i32) {
    %c0_i32 = arith.constant 0 : i32
    %c0_i32_0 = arith.constant 0 : i32
    %c0_i32_1 = arith.constant 0 : i32
    return %c0_i32, %c0_i32_0 : i32, i32
  }
  func.func @transform_10(%arg0: i32, %arg1: i32) -> (i32, i32) {
    %c0_i32 = arith.constant 0 : i32
    %c0_i32_0 = arith.constant 0 : i32
    %c0_i32_1 = arith.constant 0 : i32
    return %c0_i32, %c0_i32_0 : i32, i32
  }
  func.func @transform_11(%arg0: i32, %arg1: i32) -> (i32, i32, i32) {
    %c0_i32 = arith.constant 0 : i32
    %c0_i32_0 = arith.constant 0 : i32
    return %arg0, %arg1, %c0_i32 : i32, i32, i32
  }
}

</mosaic_0001>

<bundles_post_ra>
// kernel: tpu_custom_call.1
= control target key start
LH: loop header
LB: loop body
LE: loop exit
PB: predicated region body
PF: predicated region fallthrough
CT: control target
= control target key end

     0   :  { %s3265_s0 = inlined_call_operand.hbm [shape: f32[2,8,32], index: 0, kind: input, shape index: {}]   ;;  %s3266_s1 = inlined_call_operand.hbm [shape: f32[2,8,32], index: 1, kind: input, shape index: {}]   ;;  %s3267_s2 = inlined_call_operand.hbm [shape: f32[2,8,32], index: 2, kind: input, shape index: {}]   ;;  %s3268_s3 = inlined_call_operand.hbm [shape: f32[32,32], index: 3, kind: input, shape index: {}]   ;;  %s3269_s4 = inlined_call_operand.hbm [shape: f32[32,32], index: 4, kind: input, shape index: {}]   ;;  %s3270_s5 = inlined_call_operand.hbm [shape: f32[32,32], index: 5, kind: input, shape index: {}]   ;;  %s3271_s6 = inlined_call_operand.hbm [shape: f32[32,32], index: 6, kind: input, shape index: {}]   ;;  %s3272_s7 = inlined_call_operand.hbm [shape: f32[1,32], index: 7, kind: input, shape index: {}]   ;;  %s3273_s8 = inlined_call_operand.hbm [shape: f32[1,32], index: 8, kind: input, shape index: {}]   ;;  %s3274_s9 = inlined_call_operand.hbm [shape: f32[1,32], index: 9, kind: input, shape index: {}]   ;;  %s3275_s10 = inlined_call_operand.hbm [shape: f32[1,32], index: 10, kind: input, shape index: {}]   ;;  %s3276_s11 = inlined_call_operand.hbm [shape: f32[2,8,32], index: 11, kind: output, shape index: {}]  }
   0x1   :  { %3303 = sst [smem:[#allocation38_spill]] %s3265_s0 }
   0x2   :  { %3304 = sst [smem:[#allocation39_spill]] %s3266_s1 }
   0x3   :  { %3305 = sst [smem:[#allocation40_spill]] %s3267_s2 }
   0x4   :  { %3306 = sst [smem:[#allocation41_spill]] %s3268_s3 }
   0x5   :  { %3307 = sst [smem:[#allocation42_spill]] %s3269_s4 }
   0x6   :  { %3308 = sst [smem:[#allocation43_spill]] %s3270_s5 }
   0x7   :  { %3309 = sst [smem:[#allocation44_spill]] %s3272_s7 }
   0x8   :  { %3310 = sst [smem:[#allocation45_spill]] %s3274_s9 }
   0x9   :  { %3311 = sst [smem:[#allocation46_spill]] %s3276_s11 }
   0xa   :  { %16 = vsyncpa [#allocation6], 0 }
   0xb   :  { %18 = vsyncpa [#allocation6 + $0x1], 0 }
   0xc   :  { %19 = vsyncpa [#allocation9], 0 }
   0xd   :  { %21 = vsyncpa [#allocation9 + $0x1], 0 }
   0xe   :  { %22 = vsyncpa [#allocation12], 0 }
   0xf   :  { %23 = vsyncpa [#allocation15], 0 }
  0x10   :  { %24 = vsyncpa [#allocation18], 0 }
  0x11   :  { %25 = vsyncpa [#allocation21], 0 }
  0x12   :  { %26 = vsyncpa [#allocation7], 0 }
  0x13   :  { %28 = vsyncpa [#allocation7 + $0x1], 0  ;;  %s2720_s17 = smov 0   ;;  %s2722_s18 = smov 0  }
  0x14   :  { %s2724_s19 = smov 0   ;;  %s2726_s20 = smov 0  }
  0x15   :  { %s2728_s21 = smov 0   ;;  %s2730_s22 = smov 0  }
  0x16 LB: > { %3312 = sst [smem:[#allocation31_spill]] %s2627_s20  ;;  %s2751_s23 = sadd.s32 4294967295, %s2635_s22   ;;  %s2635_s22 = sphi %s2730_s22, %s34_s22   ;;  %s2631_s21 = sphi %s2728_s21, %s3365_s21   ;;  %s2627_s20 = sphi %s2726_s20, %s3364_s20   ;;  %s2623_s19 = sphi %s2724_s19, %s3368_s19   ;;  %s2619_s18 = sphi %s2722_s18, %s3367_s18   ;;  %s2615_s17 = sphi %s2720_s17, %s3366_s17  }
  0x17   : > { %3313 = sst [smem:[#allocation32_spill]] %s2631_s21  ;;  %p1842_p0 = scmp.ge.s32.totalorder %s2635_s22, 1 }
  0x18   : > { %3314 = sst [smem:[#allocation33_spill]] %s2635_s22  ;;  %p3281_p1 = scmp.eq.s32.totalorder %s2751_s23, 0 }
  0x19   : > { %p327_p2 = scmp.lt.s32.totalorder %s2635_s22, 3  ;;  %s2637_s25 = smov [#allocation11]  }
  0x1a   : > { %s339_s26 = sshll.u32 %s2637_s25, 4  ;;  %s2638_s28 = smov [#allocation14]   ;;  %s2760_s26 = int_to_ptr.vmem [resolvable:$true] %s339_s26 }
  0x1b   : > { %p2756_p3 = pnand %p1842_p0, %p327_p2  ;;  %s365_s29 = sshll.u32 %s2638_s28, 4  ;;  %s2771_s29 = int_to_ptr.vmem [resolvable:$true] %s365_s29 }
  0x1c   : > { %s2639_s30 = smov [#allocation17]   ;;  %s3318_s3 = sld [smem:[#allocation41_spill]] }
  0x1d   : > { %s3315_s24 = scalar_select %p2756_p3, 1, 0 }
  0x1e   : > { %p2079_p4 = pneg %p2756_p3  ;;  %s2773_s12 = sshll.u32 %s2639_s30, 4  ;;  %s393_s12 = int_to_ptr.vmem [resolvable:$true] %s2773_s12 }
  0x1f   : > { %3316 = sst [smem:[#allocation34_spill]] %s3315_s24 }
  0x20   : > { %p2767_p6 = pnand %p2079_p4, %p3281_p1 }
  0x22   : > { %s3317_s27 = scalar_select %p2767_p6, 1, 0 }
  0x23   : > { %s2219_s15 = scalar_lea.hbm %s3318_s3, 512  ;;  %p2783_p8 = pneg %p2767_p6 }
  0x24   : > { %p2220_p7 = scmp.ne.s32.totalorder %s3318_s3, %s2219_s15  ;;  %p2226_p11 = scmp.lt.u32.totalorder %s2219_s15, %s3318_s3 }
  0x25   : > { %s3319_s11 = scalar_select %p2783_p8, 1, 0 }
  0x26   : > { %p2222_p9 = pnand %p2783_p8, %p2220_p7 }
  0x28   : > { %p2223_p10 = pneg %p2222_p9 }
  0x2a   : > { %p2228_p12 = pnand %p2226_p11, %p2223_p10 }
  0x2c   : > { %2231 = shalt.err (!%p2228_p12)
}
  0x2d   : > { %s2232_s13 = scalar_lea.vmem %s2760_s26, 512  ;;  %p2240_p4 = scmp.lt.s32.totalorder %s2760_s26, %s2760_s26 }
  0x2e   : > { %p2233_p13 = scmp.ne.s32.totalorder %s2760_s26, %s2232_s13  ;;  %p2241_p5 = scmp.lt.s32.totalorder %s2232_s13, %s2232_s13 }
  0x30   : > { %p2235_p0 = pnand %p2233_p13, %p2783_p8  ;;  %p2242_p7 = por %p2241_p5, %p2240_p4 }
  0x32   : > { %p2236_p2 = pneg %p2235_p0 }
  0x34   : > { %p2243_p9 = pnand %p2242_p7, %p2236_p2 }
  0x36   : > { %2246 = shalt.err (!%p2243_p9)
}
  0x37   : > { %s3283_s14 = smov 128   ;;  %s3285_s15 = smov 8  }
  0x38   : > { %2082 = dma.hbm_to_vmem [thread:$0]  (!%p2767_p6), %s3318_s3, 512, %s2760_s26, [#allocation12], %s3283_s14, %s3283_s14, %s3285_s15  }
  0x39   : > { %s3320_s5 = sld [smem:[#allocation43_spill]] }
  0x3f   : > { %s2247_s13 = scalar_lea.hbm %s3320_s5, 512 }
  0x40   : > { %p2248_p5 = scmp.ne.s32.totalorder %s3320_s5, %s2247_s13  ;;  %p2254_p12 = scmp.lt.u32.totalorder %s2247_s13, %s3320_s5 }
  0x42   : > { %p2250_p10 = pnand %p2248_p5, %p2783_p8 }
  0x44   : > { %p2251_p11 = pneg %p2250_p10 }
  0x46   : > { %p2256_p13 = pnand %p2254_p12, %p2251_p11 }
  0x48   : > { %2259 = shalt.err (!%p2256_p13)
}
  0x49   : > { %s2260_s26 = scalar_lea.vmem %s2771_s29, 512  ;;  %p2268_p7 = scmp.lt.s32.totalorder %s2771_s29, %s2771_s29 }
  0x4a   : > { %p2261_p0 = scmp.ne.s32.totalorder %s2771_s29, %s2260_s26  ;;  %p2269_p9 = scmp.lt.s32.totalorder %s2260_s26, %s2260_s26 }
  0x4c   : > { %p2263_p2 = pnand %p2261_p0, %p2783_p8  ;;  %p2270_p5 = por %p2269_p9, %p2268_p7 }
  0x4e   : > { %p2264_p4 = pneg %p2263_p2 }
  0x50   : > { %p2271_p10 = pnand %p2270_p5, %p2264_p4 }
  0x52   : > { %2274 = shalt.err (!%p2271_p10)
}
  0x53   : > { %2088 = dma.hbm_to_vmem [thread:$0]  (!%p2767_p6), %s3320_s5, 512, %s2771_s29, [#allocation15], %s3283_s14, %s3283_s14, %s3285_s15  }
  0x54   : > { %s3321_s7 = sld [smem:[#allocation44_spill]] }
  0x5a   : > { %s2275_s16 = scalar_lea.hbm %s3321_s7, 16 }
  0x5b   : > { %p2276_p11 = scmp.ne.s32.totalorder %s3321_s7, %s2275_s16  ;;  %p2282_p0 = scmp.lt.u32.totalorder %s2275_s16, %s3321_s7 }
  0x5d   : > { %p2278_p12 = pnand %p2276_p11, %p2783_p8 }
  0x5f   : > { %p2279_p13 = pneg %p2278_p12 }
  0x61   : > { %p2284_p2 = pnand %p2282_p0, %p2279_p13 }
  0x63   : > { %2287 = shalt.err (!%p2284_p2)
}
  0x64   : > { %s2288_s26 = scalar_lea.vmem %s393_s12, 16  ;;  %s2295_s29 = scalar_lea.vmem %s393_s12, 32 }
  0x65   : > { %p2289_p4 = scmp.ne.s32.totalorder %s393_s12, %s2288_s26  ;;  %p2296_p5 = scmp.lt.s32.totalorder %s393_s12, %s393_s12 }
  0x66   : > { %p2297_p10 = scmp.lt.s32.totalorder %s2295_s29, %s2288_s26 }
  0x67   : > { %p2291_p7 = pnand %p2289_p4, %p2783_p8 }
  0x68   : > { %p2298_p1 = por %p2297_p10, %p2296_p5 }
  0x69   : > { %p2292_p9 = pneg %p2291_p7 }
  0x6b   : > { %p2299_p3 = pnand %p2298_p1, %p2292_p9 }
  0x6d   : > { %2302 = shalt.err (!%p2299_p3)
}
  0x6e   : > { %2094 = dma.hbm_to_vmem [thread:$0]  (!%p2767_p6), %s3321_s7, 16, %s393_s12, [#allocation18]  }
  0x6f   : > { %s2642_s20 = smov [#allocation20]   ;;  %s3322_s9 = sld [smem:[#allocation45_spill]] }
  0x70   : > { %s414_s24 = sshll.u32 %s2642_s20, 4  ;;  %s415_s24 = int_to_ptr.vmem [resolvable:$true] %s414_s24 }
  0x75   : > { %s2303_s28 = scalar_lea.hbm %s3322_s9, 16 }
  0x76   : > { %p2304_p11 = scmp.ne.s32.totalorder %s3322_s9, %s2303_s28  ;;  %p2310_p12 = scmp.lt.u32.totalorder %s2303_s28, %s3322_s9 }
  0x78   : > { %p2306_p1 = pnand %p2304_p11, %p2783_p8 }
  0x7a   : > { %p2307_p3 = pneg %p2306_p1 }
  0x7c   : > { %p2312_p13 = pnand %p2310_p12, %p2307_p3 }
  0x7e   : > { %2315 = shalt.err (!%p2312_p13)
}
  0x7f   : > { %s2316_s12 = scalar_lea.vmem %s415_s24, 16  ;;  %s2323_s0 = scalar_lea.vmem %s415_s24, 32 }
  0x80   : > { %p2317_p0 = scmp.ne.s32.totalorder %s415_s24, %s2316_s12  ;;  %p2324_p7 = scmp.lt.s32.totalorder %s415_s24, %s415_s24 }
  0x81   : > { %p2325_p9 = scmp.lt.s32.totalorder %s2323_s0, %s2316_s12 }
  0x82   : > { %p2319_p2 = pnand %p2317_p0, %p2783_p8 }
  0x83   : > { %p2326_p5 = por %p2325_p9, %p2324_p7 }
  0x84   : > { %p2320_p4 = pneg %p2319_p2 }
  0x86   : > { %p2327_p10 = pnand %p2326_p5, %p2320_p4 }
  0x88   : > { %2330 = shalt.err (!%p2327_p10)
}
  0x89   : > { %2100 = dma.hbm_to_vmem [thread:$0]  (!%p2767_p6), %s3322_s9, 16, %s415_s24, [#allocation21]  }
  0x8a   : > { %s1841_s16 = sadd.s32 4294967294, %s2635_s22   ;;  %s46_s25 = sadd.s32 1, %s2631_s21 }
  0x8b   : > { %p48_p11 = scmp.ge.s32.totalorder %s46_s25, 2  ;;  %s55_s28 = sadd.s32 1, %s2623_s19 }
  0x8c   : > { %p62_p1 = scmp.ne.s32.totalorder %s2623_s19, %s2619_s18  ;;  %p63_p3 = scmp.eq.s32.totalorder %s2635_s22, 0 }
  0x8d   : > { %s3370_s25 = smov (%p48_p11, %s46_s25), 0  ;;  %p68_p13 = scmp.ne.s32.totalorder %s2619_s18, %s2615_s17 }
  0x8e   : > { %3323 = sst [smem:[#allocation35_spill]] %s3370_s25  ;;  %p2878_p12 = por %p63_p3, %p62_p1 }
  0x8f   : > { %s50_s24 = ssub.s32 %s2631_s21, %s3370_s25  ;;  %p314_p0 = scmp.eq.s32.totalorder %s2751_s23, 1 }
  0x90   : > { %p53_p2 = scmp.eq.s32.totalorder %s50_s24, 0  ;;  %p3325_p4 = scmp.eq.s32.totalorder %s2751_s23, 0 }
  0x91   : > { %p2893_p9 = por %p314_p0, %p62_p1  ;;  %p320_p5 = scmp.eq.s32.totalorder %s1841_s16, 1 }
  0x92   : > { %p2889_p7 = por %p3325_p4, %p68_p13  ;;  %p2126_p11 = scmp.lt.s32.totalorder %s2635_s22, 2 }
  0x93   : > { %s3327_s26 = scalar_select %p2893_p9, 1, 0 }
  0x94   : > { %s3326_s13 = scalar_select %p2889_p7, 1, 0 }
  0x95   : > { %s2898_s29 = scalar_select %p53_p2, %s2623_s19, %s55_s28  }
  0x96   : > { %p2900_p10 = por %p320_p5, %p68_p13  ;;  %s3287_s0 = sand.u32 1, %s2623_s19  }
  0x97   : > { %3328 = sst [smem:[#allocation36_spill]] %s2898_s29  ;;  %s2907_s2 = sshll.u32 %s2631_s21, 7 }
  0x98   : > { %s3329_s12 = scalar_select %p2900_p10, 1, 0 }
  0x99   : > { %s2911_s20 = sshll.u32 %s3287_s0, 3  ;;  %p2915_p1 = pnand %p2126_p11, %p2878_p12 }
  0x9a   : > { %3330 = sst [smem:[#allocation37_spill]] %s3329_s12  ;;  %s455_s16 = sand.u32 1, %s2635_s22  }
  0x9b   : > { %s3331_s24 = scalar_select %p2915_p1, 1, 0 }
  0x9c   : > { %s3332_s1 = sld [smem:[#allocation39_spill]]  ;;  %s459_s3 = scalar_lea.vmem [#allocation8], %s2911_s20 }
  0x9d   : > { %s466_s0 = sshll.u32 %s459_s3, 4  ;;  %s2929_s30 = scalar_lea.sflag [#allocation9], %s455_s16  ;;  %s2927_s0 = int_to_ptr.vmem [resolvable:$true] %s466_s0 }
  0x9e   : > { %p2935_p12 = pneg %p2915_p1 }
  0xa0   : > { %s3333_s7 = scalar_select %p2935_p12, 1, 0 }
  0xa2   : > { %s2924_s15 = scalar_lea.hbm %s3332_s1, %s2907_s2  ;;  %s2336_s9 = scalar_lea.hbm %s3332_s1, 256 }
  0xa3   : > { %s2331_s5 = scalar_lea.hbm %s2924_s15, 128  ;;  %p2337_p2 = scmp.lt.u32.totalorder %s2924_s15, %s3332_s1 }
  0xa4   : > { %p2332_p3 = scmp.ne.s32.totalorder %s2924_s15, %s2331_s5  ;;  %p2338_p4 = scmp.lt.u32.totalorder %s2336_s9, %s2331_s5 }
  0xa5   : > { %p2340_p11 = scmp.lt.u32.totalorder %s2331_s5, %s2924_s15 }
  0xa6   : > { %p2334_p13 = pnand %p2935_p12, %p2332_p3  ;;  %p2339_p5 = por %p2338_p4, %p2337_p2 }
  0xa8   : > { %p2335_p0 = pneg %p2334_p13  ;;  %p2341_p10 = por %p2340_p11, %p2339_p5 }
  0xaa   : > { %p2342_p9 = pnand %p2341_p10, %p2335_p0 }
  0xac   : > { %2345 = shalt.err (!%p2342_p9)
}
  0xad   : > { %s2346_s16 = scalar_lea.vmem %s2927_s0, 128  ;;  %s2643_s14 = smov [#allocation8]  }
  0xae   : > { %p2347_p3 = scmp.ne.s32.totalorder %s2927_s0, %s2346_s16  ;;  %s2351_s28 = sshll.u32 %s2643_s14, 4  ;;  %s2352_s28 = int_to_ptr.vmem [resolvable:$false] %s2351_s28 }
  0xaf   : > { %s2353_s25 = scalar_lea.vmem %s2352_s28, 256  ;;  %p2354_p6 = scmp.lt.s32.totalorder %s2927_s0, %s2352_s28 }
  0xb0   : > { %p2349_p13 = pnand %p2347_p3, %p2935_p12  ;;  %p2355_p8 = scmp.lt.s32.totalorder %s2353_s25, %s2346_s16 }
  0xb2   : > { %p2350_p7 = pneg %p2349_p13  ;;  %p2356_p2 = por %p2355_p8, %p2354_p6 }
  0xb4   : > { %p2357_p4 = pnand %p2356_p2, %p2350_p7 }
  0xb6   : > { %2360 = shalt.err (!%p2357_p4)
}
  0xb7   : > { %2110 = dma.hbm_to_vmem [thread:$0]  (!%p2915_p1), %s2924_s15, 128, %s2927_s0, %s2929_s30  }
  0xb8   : > { %s2644_s5 = smov [#allocation13]   ;;  %s2645_s3 = smov [#allocation16]  }
  0xb9   : > { %s352_s9 = sshll.u32 %s2644_s5, 4  ;;  %s378_s1 = sshll.u32 %s2645_s3, 4  ;;  %s353_s9 = int_to_ptr.vmem [resolvable:$true] %s352_s9  ;;  %s379_s1 = int_to_ptr.vmem [resolvable:$true] %s378_s1 }
  0xba   : > { %s3334_s4 = sld [smem:[#allocation42_spill]]  ;;  %p3335_p8 = scmp.ne.s32.totalorder %s3319_s11, 0 }
  0xc0   : > { %s2361_s28 = scalar_lea.hbm %s3334_s4, 512 }
  0xc1   : > { %p2362_p6 = scmp.ne.s32.totalorder %s3334_s4, %s2361_s28  ;;  %p2368_p10 = scmp.lt.u32.totalorder %s2361_s28, %s3334_s4 }
  0xc3   : > { %p2364_p7 = pnand %p2362_p6, %p3335_p8 }
  0xc5   : > { %p2365_p9 = pneg %p2364_p7 }
  0xc7   : > { %p2370_p0 = pnand %p2368_p10, %p2365_p9 }
  0xc9   : > { %2373 = shalt.err (!%p2370_p0)
}
  0xca   : > { %s2374_s15 = scalar_lea.vmem %s353_s9, 512  ;;  %p2382_p13 = scmp.lt.s32.totalorder %s353_s9, %s353_s9 }
  0xcb   : > { %p2375_p5 = scmp.ne.s32.totalorder %s353_s9, %s2374_s15  ;;  %p2383_p2 = scmp.lt.s32.totalorder %s2374_s15, %s2374_s15 }
  0xcd   : > { %p2377_p11 = pnand %p2375_p5, %p3335_p8  ;;  %p2384_p4 = por %p2383_p2, %p2382_p13 }
  0xcf   : > { %p2378_p3 = pneg %p2377_p11 }
  0xd1   : > { %p2385_p1 = pnand %p2384_p4, %p2378_p3 }
  0xd3   : > { %2388 = shalt.err (!%p2385_p1)
}
  0xd4   : > { %p3336_p6 = scmp.ne.s32.totalorder %s3317_s27, 0  ;;  %s3337_s21 = smov 8  }
  0xd5   : > { %s3338_s0 = smov 128   ;;  %s2389_s14 = scalar_lea.hbm %s3271_s6, 512 }
  0xd6   : > { %2085 = dma.hbm_to_vmem [thread:$0]  (!%p3336_p6), %s3334_s4, 512, %s353_s9, [#allocation12], %s3338_s0, %s3338_s0, %s3337_s21  }
  0xd7   : > { %p2390_p7 = scmp.ne.s32.totalorder %s3271_s6, %s2389_s14  ;;  %p2396_p10 = scmp.lt.u32.totalorder %s2389_s14, %s3271_s6 }
  0xd9   : > { %p2392_p1 = pnand %p2390_p7, %p3335_p8 }
  0xdb   : > { %p2393_p9 = pneg %p2392_p1 }
  0xdd   : > { %p2398_p0 = pnand %p2396_p10, %p2393_p9 }
  0xdf   : > { %2401 = shalt.err (!%p2398_p0)
}
  0xe0   : > { %s2402_s22 = scalar_lea.vmem %s379_s1, 512  ;;  %p2410_p13 = scmp.lt.s32.totalorder %s379_s1, %s379_s1 }
  0xe1   : > { %p2403_p5 = scmp.ne.s32.totalorder %s379_s1, %s2402_s22  ;;  %p2411_p2 = scmp.lt.s32.totalorder %s2402_s22, %s2402_s22 }
  0xe3   : > { %p2405_p11 = pnand %p2403_p5, %p3335_p8  ;;  %p2412_p4 = por %p2411_p2, %p2410_p13 }
  0xe5   : > { %p2406_p3 = pneg %p2405_p11 }
  0xe7   : > { %p2413_p12 = pnand %p2412_p4, %p2406_p3 }
  0xe9   : > { %2416 = shalt.err (!%p2413_p12)
}
  0xea   : > { %2091 = dma.hbm_to_vmem [thread:$0]  (!%p3336_p6), %s3271_s6, 512, %s379_s1, [#allocation15], %s3338_s0, %s3338_s0, %s3337_s21  }
  0xeb   : > { %s2646_s5 = smov [#allocation19]   ;;  %s2647_s14 = smov [#allocation22]  }
  0xec   : > { %s403_s3 = sshll.u32 %s2646_s5, 4  ;;  %s425_s28 = sshll.u32 %s2647_s14, 4  ;;  %s404_s3 = int_to_ptr.vmem [resolvable:$true] %s403_s3  ;;  %s426_s28 = int_to_ptr.vmem [resolvable:$true] %s425_s28 }
  0xed   : > { %s2417_s15 = scalar_lea.hbm %s3273_s8, 16 }
  0xee   : > { %p2418_p12 = scmp.ne.s32.totalorder %s3273_s8, %s2417_s15  ;;  %p2424_p9 = scmp.lt.u32.totalorder %s2417_s15, %s3273_s8 }
  0xf0   : > { %p2420_p7 = pnand %p2418_p12, %p3335_p8 }
  0xf2   : > { %p2421_p1 = pneg %p2420_p7 }
  0xf4   : > { %p2426_p10 = pnand %p2424_p9, %p2421_p1 }
  0xf6   : > { %2429 = shalt.err (!%p2426_p10)
}
  0xf7   : > { %s2430_s1 = scalar_lea.vmem %s404_s3, 16  ;;  %s2437_s21 = scalar_lea.vmem %s404_s3, 32 }
  0xf8   : > { %p2431_p0 = scmp.ne.s32.totalorder %s404_s3, %s2430_s1  ;;  %p2438_p3 = scmp.lt.s32.totalorder %s404_s3, %s404_s3 }
  0xf9   : > { %p2439_p13 = scmp.lt.s32.totalorder %s2437_s21, %s2430_s1 }
  0xfa   : > { %p2433_p5 = pnand %p2431_p0, %p3335_p8 }
  0xfb   : > { %p2440_p2 = por %p2439_p13, %p2438_p3 }
  0xfc   : > { %p2434_p11 = pneg %p2433_p5 }
  0xfe   : > { %p2441_p4 = pnand %p2440_p2, %p2434_p11 }
 0x100   : > { %2444 = shalt.err (!%p2441_p4)
}
 0x101   : > { %2097 = dma.hbm_to_vmem [thread:$0]  (!%p3336_p6), %s3273_s8, 16, %s404_s3, [#allocation18]  }
 0x102   : > { %s2445_s5 = scalar_lea.hbm %s3275_s10, 16 }
 0x103   : > { %p2446_p12 = scmp.ne.s32.totalorder %s3275_s10, %s2445_s5  ;;  %p2452_p9 = scmp.lt.u32.totalorder %s2445_s5, %s3275_s10 }
 0x105   : > { %p2448_p7 = pnand %p2446_p12, %p3335_p8 }
 0x107   : > { %p2449_p1 = pneg %p2448_p7 }
 0x109   : > { %p2454_p10 = pnand %p2452_p9, %p2449_p1 }
 0x10b   : > { %2457 = shalt.err (!%p2454_p10)
}
 0x10c   : > { %s2458_s22 = scalar_lea.vmem %s426_s28, 16  ;;  %s2465_s3 = scalar_lea.vmem %s426_s28, 32 }
 0x10d   : > { %p2459_p0 = scmp.ne.s32.totalorder %s426_s28, %s2458_s22  ;;  %p2466_p3 = scmp.lt.s32.totalorder %s426_s28, %s426_s28 }
 0x10e   : > { %p2467_p13 = scmp.lt.s32.totalorder %s2465_s3, %s2458_s22 }
 0x10f   : > { %p2461_p5 = pnand %p2459_p0, %p3335_p8 }
 0x110   : > { %p2468_p2 = por %p2467_p13, %p2466_p3 }
 0x111   : > { %p2462_p11 = pneg %p2461_p5 }
 0x113   : > { %p2469_p4 = pnand %p2468_p2, %p2462_p11 }
 0x115   : > { %2472 = shalt.err (!%p2469_p4)
}
 0x116   : > { %2103 = dma.hbm_to_vmem [thread:$0]  (!%p3336_p6), %s3275_s10, 16, %s426_s28, [#allocation21]  }
 0x117   : > { %s3339_s4 = sld [smem:[#allocation38_spill]]  ;;  %s440_s12 = scalar_lea.vmem [#allocation5], %s2911_s20 }
 0x118   : > { %s448_s27 = sshll.u32 %s440_s12, 4  ;;  %s3340_s14 = sld [smem:[#allocation40_spill]]  ;;  %s3044_s27 = int_to_ptr.vmem [resolvable:$true] %s448_s27 }
 0x119   : > { %s3341_s25 = sand.u32 1, %s2623_s19   ;;  %p3342_p6 = scmp.ne.s32.totalorder %s3333_s7, 0 }
 0x11a   : > { %s437_s28 = scalar_lea.sflag [#allocation6], %s3341_s25 }
 0x11d   : > { %s3041_s0 = scalar_lea.hbm %s3339_s4, %s2907_s2  ;;  %s2478_s9 = scalar_lea.hbm %s3339_s4, 256 }
 0x11e   : > { %s3050_s16 = scalar_lea.hbm %s3340_s14, %s2907_s2  ;;  %s2473_s15 = scalar_lea.hbm %s3041_s0, 128 }
 0x11f   : > { %p2474_p8 = scmp.ne.s32.totalorder %s3041_s0, %s2473_s15  ;;  %p2479_p1 = scmp.lt.u32.totalorder %s3041_s0, %s3339_s4 }
 0x120   : > { %p2480_p9 = scmp.lt.u32.totalorder %s2478_s9, %s2473_s15  ;;  %p2482_p0 = scmp.lt.u32.totalorder %s2473_s15, %s3041_s0 }
 0x121   : > { %p2476_p12 = pnand %p2474_p8, %p3342_p6 }
 0x122   : > { %p2481_p10 = por %p2480_p9, %p2479_p1 }
 0x123   : > { %p2477_p7 = pneg %p2476_p12 }
 0x124   : > { %p2483_p5 = por %p2482_p0, %p2481_p10 }
 0x126   : > { %p2484_p11 = pnand %p2483_p5, %p2477_p7 }
 0x128   : > { %2487 = shalt.err (!%p2484_p11)
}
 0x129   : > { %s2488_s2 = scalar_lea.vmem %s3044_s27, 128  ;;  %s2648_s21 = smov [#allocation5]  }
 0x12a   : > { %p2489_p3 = scmp.ne.s32.totalorder %s3044_s27, %s2488_s2  ;;  %s2493_s12 = sshll.u32 %s2648_s21, 4  ;;  %s2494_s12 = int_to_ptr.vmem [resolvable:$false] %s2493_s12 }
 0x12b   : > { %s2495_s29 = scalar_lea.vmem %s2494_s12, 256  ;;  %p2496_p4 = scmp.lt.s32.totalorder %s3044_s27, %s2494_s12 }
 0x12c   : > { %p2491_p13 = pnand %p2489_p3, %p3342_p6  ;;  %p2497_p8 = scmp.lt.s32.totalorder %s2495_s29, %s2488_s2 }
 0x12e   : > { %p2492_p2 = pneg %p2491_p13  ;;  %p2498_p12 = por %p2497_p8, %p2496_p4 }
 0x130   : > { %p2499_p1 = pnand %p2498_p12, %p2492_p2 }
 0x132   : > { %2502 = shalt.err (!%p2499_p1)
}
 0x133   : > { %p3343_p7 = scmp.ne.s32.totalorder %s3331_s24, 0  ;;  %s477_s5 = scalar_lea.vmem [#allocation10], %s2911_s20 }
 0x134   : > { %s484_s25 = sshll.u32 %s477_s5, 4  ;;  %s2503_s15 = scalar_lea.hbm %s3050_s16, 128  ;;  %s485_s25 = int_to_ptr.vmem [resolvable:$true] %s484_s25 }
 0x135   : > { %2107 = dma.hbm_to_vmem [thread:$0]  (!%p3343_p7), %s3041_s0, 128, %s3044_s27, %s437_s28  }
 0x136   : > { %p2504_p9 = scmp.ne.s32.totalorder %s3050_s16, %s2503_s15  ;;  %s2508_s9 = scalar_lea.hbm %s3340_s14, 256 }
 0x137   : > { %p2509_p5 = scmp.lt.u32.totalorder %s3050_s16, %s3340_s14  ;;  %p2510_p11 = scmp.lt.u32.totalorder %s2508_s9, %s2503_s15 }
 0x138   : > { %p2506_p10 = pnand %p2504_p9, %p3342_p6  ;;  %p2512_p13 = scmp.lt.u32.totalorder %s2503_s15, %s3050_s16 }
 0x139   : > { %p2511_p3 = por %p2510_p11, %p2509_p5 }
 0x13a   : > { %p2507_p0 = pneg %p2506_p10 }
 0x13b   : > { %p2513_p2 = por %p2512_p13, %p2511_p3 }
 0x13d   : > { %p2514_p4 = pnand %p2513_p2, %p2507_p0 }
 0x13f   : > { %2517 = shalt.err (!%p2514_p4)
}
 0x140   : > { %s2518_s20 = scalar_lea.vmem %s485_s25, 128  ;;  %s2649_s0 = smov [#allocation10]  }
 0x141   : > { %p2519_p8 = scmp.ne.s32.totalorder %s485_s25, %s2518_s20  ;;  %s2523_s27 = sshll.u32 %s2649_s0, 4  ;;  %s2524_s27 = int_to_ptr.vmem [resolvable:$false] %s2523_s27 }
 0x142   : > { %s2525_s28 = scalar_lea.vmem %s2524_s27, 256  ;;  %p2526_p9 = scmp.lt.s32.totalorder %s485_s25, %s2524_s27 }
 0x143   : > { %p2521_p12 = pnand %p2519_p8, %p3342_p6  ;;  %p2527_p10 = scmp.lt.s32.totalorder %s2525_s28, %s2518_s20 }
 0x145   : > { %p2522_p1 = pneg %p2521_p12  ;;  %p2528_p7 = por %p2527_p10, %p2526_p9 }
 0x147   : > { %p2529_p5 = pnand %p2528_p7, %p2522_p1 }
 0x149   : > { %2532 = shalt.err (!%p2529_p5)
}
 0x14a   : > { %p3344_p11 = scmp.ne.s32.totalorder %s3331_s24, 0  ;;  %s3345_s2 = sld [smem:[#allocation34_spill]] }
 0x14c   : > { %2113 = dma.hbm_to_vmem [thread:$0]  (!%p3344_p11), %s3050_s16, 128, %s485_s25, %s2929_s30  }
 0x150   : > { %p3346_p0 = scmp.ne.s32.totalorder %s3345_s2, 0 }
 0x151   : > { %s3097_s7 = sand.u32 (!%p3346_p0), 1, %s2619_s18   ;;  %p3347_p6 = scmp.ne.s32.totalorder (!%p3346_p0), %s3326_s13, 0 }
 0x152   : > { %493 = sbr.rel (%p3346_p0) target bundleno = 1915 (0x77b), region = 64  ;;  %s3100_s21 = sshll.u32 (!%p3346_p0), %s3097_s7, 3 }
 0x153   : > { %s496_s12 = scalar_lea.sflag (!%p3346_p0), [#allocation6], %s3097_s7  ;;  %s499_s29 = scalar_lea.vmem (!%p3346_p0), [#allocation5], %s3100_s21 }
 0x159   : > { %2586 = dma.done.wait (%p3347_p6), %s496_s12, 128  }
 0x15a   : > { %2588 = vsyncadd (%p3347_p6), %s496_s12, 4294967168  ;;  %s504_s24 = sand.u32 1, %s2751_s23   ;;  %s508_s16 = scalar_lea.vmem [#allocation8], %s3100_s21 }
 0x15b   : > { %s505_s30 = scalar_lea.sflag [#allocation9], %s504_s24 }
 0x15c   : > { %2590 = dma.done.wait (%p3347_p6), %s505_s30, 256  }
 0x15d   : > { %2592 = vsyncadd (%p3347_p6), %s505_s30, 4294967040  ;;  %s517_s5 = scalar_lea.vmem [#allocation10], %s3100_s21  ;;  %p3348_p7 = scmp.eq.s32.totalorder %s2751_s23, 0 }
 0x15f   : > { %2594 = dma.done.wait (%p3348_p7), [#allocation12], 1024   ;;  %p3349_p3 = pmov %p3348_p7 }
 0x161   : > { %2596 = vsyncadd (%p3349_p3), [#allocation12], 4294966272  ;;  %p3350_p13 = pmov %p3349_p3 }
 0x162   : > { %p3351_p2 = pmov %p3349_p3 }
 0x163   : > { %2598 = dma.done.wait (%p3350_p13), [#allocation15], 1024  }
 0x164   : > { %2600 = vsyncadd (%p3351_p2), [#allocation15], 4294966272  ;;  %p3352_p4 = pmov %p3351_p2 }
 0x165   : > { %p3353_p8 = pmov %p3351_p2 }
 0x166   : > { %2602 = dma.done.wait (%p3352_p4), [#allocation18], 32  }
 0x167   : > { %2604 = vsyncadd (%p3353_p8), [#allocation18], 4294967264  ;;  %p3354_p12 = pmov %p3351_p2 }
 0x168   : > { %p3355_p1 = pmov %p3351_p2 }
 0x169   : > { %2606 = dma.done.wait (%p3354_p12), [#allocation21], 32  }
 0x16a   : > { %2608 = vsyncadd (%p3355_p1), [#allocation21], 4294967264  ;;  %v2650_v0 = vmov 0.0|0.0   ;;  %vm2651_vm0 = vmmov 0   ;;  %v2652_v1 = vmov 0.0   ;;  %v603_v2 = vld [vmem:[#allocation13] sm:$0xff] }
 0x16b   : > { %2015 = vmatprep.subr.bf16.mxu0 %v2650_v0  ;;  %1939 = vmatprep.mubr.msk.f32.mxu0 %vm2651_vm0, %v2652_v1  ;;  %v604_v3 = vld [vmem:[#allocation13 + $0x8] sm:$0xff]  ;;  %v605_v4 = vld [vmem:[#allocation13 + $0x10] sm:$0xff]  ;;  %v606_v6 = vld [vmem:[#allocation13 + $0x18] sm:$0xff]  ;;  %vm614_vm1 = vcmask 261120   ;;  %vm864_vm2 = vcmask 64512   ;;  %s2653_s23 = smov 120  }
 0x16c   : > { %2021 = vmatprep.subr.bf16.mxu1 %v2650_v0  ;;  %1950 = vmatprep.mubr.msk.f32.mxu1 %vm2651_vm0, %v2652_v1  ;;  %v2016_v5 = vpack.c.bf16 %v604_v3, %v603_v2  ;;  %v2019_v7 = vpack.c.bf16 %v606_v6, %v605_v4  ;;  %v690_v8 = vld [vmem:[#allocation14] sm:$0xff]  ;;  %v691_v9 = vld [vmem:[#allocation14 + $0x8] sm:$0xff]  ;;  %v778_v15 = vld [vmem:[#allocation11 + $0x10] sm:$0xff]  ;;  %s2654_s13 = smov 112   ;;  %s2655_s25 = smov 104   ;;  %vm1196_vm3 = vcmask 130112  }
 0x16d   : > { %v776_v10 = vld [vmem:[#allocation11] sm:$0xff]  ;;  %v777_v11 = vld [vmem:[#allocation11 + $0x8] sm:$0xff]  ;;  %v2022_v12 = vpack.c.bf16 %v691_v9, %v690_v8  ;;  %v779_v16 = vld [vmem:[#allocation11 + $0x18] sm:$0xff]  ;;  %s2656_s15 = smov 8   ;;  %s2657_s22 = smov 16   ;;  %vm1367_vm4 = vcmask 195712  }
 0x16e   : > { %2017 = vmatpush3.bf16.msra.mxu0 %v2016_v5  ;;  %v602_v13 = vld [vmem:[%s508_s16] sm:$0xff]  ;;  %v2028_v14 = vpack.c.bf16 %v777_v11, %v776_v10  ;;  %v2031_v17 = vpack.c.bf16 %v779_v16, %v778_v15  ;;  %v775_v18 = vld [vmem:[%s499_s29] sm:$0xff]  ;;  %s3356_s3 = sld [smem:[#allocation31_spill]]  ;;  %s2658_s9 = smov 24   ;;  %vm1538_vm5 = vcmask 261312  }
 0x16f   : > { %2018 = vmatprep.subr.bf16.mxu0 %v2650_v0  ;;  %2023 = vmatpush3.bf16.msra.mxu1 %v2022_v12  ;;  %v692_v19 = vld [vmem:[#allocation14 + $0x10] sm:$0xff]  ;;  %v693_v20 = vld [vmem:[#allocation14 + $0x18] sm:$0xff]  ;;  %v1871_v23 = vld [vmem:[#allocation19] ss:$0 sm:$0xff]  ;;  %s597_s11 = scalar_lea.vmem [#allocation23], %s3100_s21  ;;  %s3357_s28 = sld [smem:[#allocation46_spill]] }
 0x170   : > { %2024 = vmatprep.subr.bf16.mxu1 %v2650_v0  ;;  %v2025_v21 = vpack.c.bf16 %v693_v20, %v692_v19  ;;  %v689_v22 = vld [vmem:[%s517_s5] sm:$0xff]  ;;  %v1875_v27 = vld [vmem:[#allocation17] ss:$0 sm:$0xff]  ;;  %v1873_v33 = vld [vmem:[#allocation20] ss:$0 sm:$0xff]  ;;  %s1641_s20 = sshll.u32 %s597_s11, 4  ;;  %s3217_s20 = int_to_ptr.vmem [resolvable:$true] %s1641_s20 }
 0x171   : > { %s1627_s12 = scalar_lea.sflag [#allocation7], %s3097_s7  ;;  %s2533_s29 = scalar_lea.vmem %s3217_s20, 128 }
 0x172   : > { %2020 = vmatpush3.bf16.msra.mxu0 %v2019_v7  ;;  %p2534_p9 = scmp.ne.s32.totalorder %s3217_s20, %s2533_s29  ;;  %p3358_p10 = scmp.ne.s32.totalorder %s3327_s26, 0 }
 0x173   : > { %2027 = vmatprep.subr.bf16.mxu0 %v2650_v0  ;;  %2026 = vmatpush3.bf16.msra.mxu1 %v2025_v21  ;;  %s2659_s21 = smov [#allocation23]  }
 0x174   : > { %1964 = vmatprep.subr.mxu1 %v2652_v1  ;;  %s1892_s1 = sshll.u32 %s3356_s3, 7  ;;  %p2535_p5 = pnand %p2534_p9, %p3358_p10 }
 0x175   : > { %1940 = vmatmul.mubr.msk.f32.vlgmr.msra.gmra.mrb[0].mxu0 %vm614_vm1, %v602_v13  ;;  %s3215_s2 = scalar_lea.hbm %s3357_s28, %s1892_s1  ;;  %s2537_s24 = sshll.u32 %s2659_s21, 4  ;;  %s2538_s24 = int_to_ptr.vmem [resolvable:$false] %s2537_s24 }
 0x176   : > { %2029 = vmatpush3.bf16.msra.mxu0 %v2028_v14  ;;  %1961 = vmatprep.mubr.msk.f32.mxu0 %vm2651_vm0, %v2652_v1  ;;  %p2536_p11 = pneg %p2535_p5  ;;  %s2539_s30 = scalar_lea.vmem %s2538_s24, 256 }
 0x177   : > { %2030 = vmatprep.subr.bf16.mxu0 %v2650_v0  ;;  %1951 = vmatmul.mubr.msk.f32.vlgmr.msra.gmra.mrb[0].mxu1 %vm614_vm1, %v689_v22  ;;  %p2540_p0 = scmp.lt.s32.totalorder %s3217_s20, %s2538_s24  ;;  %p2541_p6 = scmp.lt.s32.totalorder %s2539_s30, %s2533_s29 }
 0x178   : > { %1966 = vmatprep.mubr.msk.f32.mxu1 %vm2651_vm0, %v2652_v1 }
 0x179   : > { %p2542_p7 = por %p2541_p6, %p2540_p0 }
 0x17a   : > { %2032 = vmatpush3.bf16.msra.mxu0 %v2031_v17 }
 0x17b   : > { %1984 = vmatprep.subr.mxu0 %v2652_v1  ;;  %p2543_p3 = pnand %p2542_p7, %p2536_p11 }
 0x17d   : > { %1962 = vmatmul.mubr.msk.f32.vlgmr.msra.gmra.mrb[2].mxu0 %vm614_vm1, %v775_v18 }
 0x17e   : > { %1986 = vmatprep.mubr.msk.f32.mxu0 %vm2651_vm0, %v2652_v1 }
 0x248   : > { %v684_v24 = vpop.f32.mrb[0].mxu0 }
 0x249   : > { %v685_v25 = vadd.f32 %v1871_v23, %v684_v24  ;;  %v1941_v26 = vpop.f32.mrb[1].mxu0 }
 0x24a   : > { %v770_v34 = vpop.f32.mrb[0].mxu1  ;;  %v1542_v26 = vld [vmem:[#allocation16 + $0x8] sm:$0xff] }
 0x24b   : > { %688 = vst.msk [vmem:[#allocation2] sm:$0xff] %vm614_vm1, %v685_v25  ;;  %v771_v35 = vadd.f32 %v1873_v33, %v770_v34  ;;  %v1952_v36 = vpop.f32.mrb[1].mxu1  ;;  %v1541_v25 = vld [vmem:[#allocation16] sm:$0xff] }
 0x24d   : > { %774 = vst.msk [vmem:[#allocation3] sm:$0xff] %vm614_vm1, %v771_v35 }
 0x250   : > { %v857_v28 = vpop.f32.mrb[2].mxu0 }
 0x251   : > { %v858_v29 = vadd.f32 %v1875_v27, %v857_v28  ;;  %v1963_v30 = vpop.f32.mrb[3].mxu0  ;;  %v1543_v27 = vld [vmem:[#allocation16 + $0x10] sm:$0xff]  ;;  %v1544_v28 = vld [vmem:[#allocation16 + $0x18] sm:$0xff] }
 0x252   : > { %v862_v31 = vld [vmem:[#allocation2] sm:$0xff] }
 0x253   : > { %v861_v32 = vmul.f32 0.35355338, %v858_v29  ;;  %1965 = vmatpush3.xpose.msk.msra.mxu1 %vm864_vm2, %v862_v31 }
 0x254   : > { %1969 = vmatprep.subr.mxu1 %v2652_v1  ;;  %v863_v37 = vld [vmem:[#allocation3] sm:$0xff] }
 0x255   : > { %1026 = vrot.lane.b32.xlu1 %v861_v32, %s2653_s23 }
 0x256   : > { %1967 = vmatmul.mubr.msk.f32.vlgmr.msra.gmra.mrb[2].mxu1 %vm864_vm2, %v861_v32 }
 0x257   : > { %1971 = vmatprep.mubr.msk.f32.mxu1 %vm2651_vm0, %v2652_v1  ;;  %1970 = vmatpush3.msra.mxu1 %v863_v37 }
 0x258   : > { %1974 = vmatprep.subr.mxu1 %v2652_v1 }
 0x259   : > { %1200 = vrot.lane.b32.xlu1 %v862_v31, %s2654_s13 }
 0x25d   : > { %1198 = vrot.lane.b32.xlu1 %v861_v32, %s2654_s13 }
 0x261   : > { %1371 = vrot.lane.b32.xlu1 %v862_v31, %s2655_s25 }
 0x265   : > { %1369 = vrot.lane.b32.xlu1 %v861_v32, %s2655_s25 }
 0x269   : > { %1285 = vrot.lane.b32.xlu1 %v863_v37, %s2654_s13 }
 0x2c7   : > { %v1027_v38 = vpop.permute.xlu1 %1026 }
 0x2cb   : > { %v1201_v39 = vpop.permute.xlu1 %1200 }
 0x2cc   : > { %1985 = vmatpush3.xpose.msk.msra.mxu0 %vm864_vm2, %v1201_v39 }
 0x2cd   : > { %1994 = vmatprep.subr.mxu0 %v2652_v1 }
 0x2cf   : > { %v1199_v40 = vpop.permute.xlu1 %1198 }
 0x2d0   : > { %1987 = vmatmul.mubr.msk.f32.vlgmr.msra.gmra.mrb[4].mxu0 %vm864_vm2, %v1199_v40 }
 0x2d1   : > { %1996 = vmatprep.mubr.msk.f32.mxu0 %vm2651_vm0, %v2652_v1 }
 0x2d3   : > { %v1372_v41 = vpop.permute.xlu1 %1371 }
 0x2d4   : > { %1995 = vmatpush3.xpose.msk.msra.mxu0 %vm864_vm2, %v1372_v41 }
 0x2d5   : > { %2033 = vmatprep.subr.bf16.mxu0 %v2650_v0 }
 0x2d7   : > { %v1370_v42 = vpop.permute.xlu1 %1369 }
 0x2d8   : > { %1997 = vmatmul.mubr.msk.f32.vlgmr.msra.gmra.mrb[6].mxu0 %vm864_vm2, %v1370_v42 }
 0x2d9   : > { %2012 = vmatprep.mubr.msk.f32.mxu0 %vm2651_vm0, %v2652_v1 }
 0x2db   : > { %v1286_v6 = vpop.permute.xlu1 %1285 }
 0x329   : > { %v937_v43 = vpop.f32.mrb[2].mxu1 }
 0x32a   : > { %v1968_v44 = vpop.f32.mrb[3].mxu1  ;;  %v941_v45 = vsel %vm864_vm2, %v937_v43, -inf }
 0x32b   : > { %942 = vmax.xlane.f32.xlu0 %v941_v45  ;;  %v1889_v45 = vld [vmem:[#allocation22] ss:$0 sm:$0xff] }
 0x341   : > { %1028 = vrot.lane.b32.xlu0 %v862_v31, %s2653_s23  ;;  %v2037_v31 = vpack.c.bf16 %v1544_v28, %v1543_v27 }
 0x3a3   : > { %v1272_v46 = vpop.f32.mrb[4].mxu0 }
 0x3a4   : > { %v1988_v47 = vpop.f32.mrb[5].mxu0  ;;  %v1276_v48 = vsel %vm864_vm2, %v1272_v46, -inf }
 0x3a5   : > { %1277 = vmax.xlane.f32.xlu0 %v1276_v48 }
 0x3ab   : > { %v1443_v49 = vpop.f32.mrb[6].mxu0 }
 0x3ac   : > { %v1998_v50 = vpop.f32.mrb[7].mxu0  ;;  %v1447_v51 = vsel %vm864_vm2, %v1443_v49, -inf }
 0x3ad   : > { %1448 = vmax.xlane.f32.xlu1 %v1447_v51 }
 0x3b8   : > { %v943_v52 = vpop.xlane.xlu0 %942 }
 0x3b9   : > { %v944_v53 = vsub.f32 %v937_v43, %v943_v52 }
 0x3bb   : > { %v945_v54 = vmul.f32 1.442695, %v944_v53  ;;  %1114 = vrot.lane.b32.xlu0 %v863_v37, %s2653_s23 }
 0x3bc   : > { %v1029_v56 = vpop.permute.xlu0 %1028 }
 0x3bd   : > { %2203 = vpow2.f32 %v945_v54 }
 0x3c7   : > { %v2204_v55 = vpop.eup %2203 }
 0x3c8   : > { %1972 = vmatmul.mubr.msk.f32.vlgmr.msra.gmra.mrb[4].mxu1 %vm864_vm2, %v2204_v55  ;;  %v947_v18 = vsel %vm864_vm2, %v2204_v55, 0.0 }
 0x3c9   : > { %1975 = vmatpush3.xpose.msk.msra.mxu1 %vm864_vm2, %v1029_v56  ;;  %1976 = vmatprep.mubr.msk.f32.mxu1 %vm2651_vm0, %v2652_v1 }
 0x3ca   : > { %1979 = vmatprep.subr.mxu1 %v2652_v1 }
 0x3cc   : > { %1977 = vmatmul.mubr.msk.f32.vlgmr.msra.gmra.mrb[6].mxu1 %vm864_vm2, %v1027_v38 }
 0x3cd   : > { %1981 = vmatprep.mubr.msk.f32.mxu1 %vm2651_vm0, %v2652_v1 }
 0x432   : > { %v1278_v57 = vpop.xlane.xlu0 %1277 }
 0x433   : > { %v1279_v58 = vsub.f32 %v1272_v46, %v1278_v57 }
 0x435   : > { %v1280_v3 = vmul.f32 1.442695, %v1279_v58 }
 0x436   : > { %v1115_v59 = vpop.permute.xlu0 %1114 }
 0x437   : > { %1980 = vmatpush3.msra.mxu1 %v1115_v59  ;;  %2205 = vpow2.f32 %v1280_v3 }
 0x438   : > { %1989 = vmatprep.subr.mxu1 %v2652_v1 }
 0x43a   : > { %v1449_v7 = vpop.xlane.xlu1 %1448 }
 0x43b   : > { %v1450_v8 = vsub.f32 %v1443_v49, %v1449_v7 }
 0x43d   : > { %v1451_v11 = vmul.f32 1.442695, %v1450_v8 }
 0x441   : > { %v2206_v4 = vpop.eup %2205 }
 0x442   : > { %v1282_v5 = vsel %vm864_vm2, %v2206_v4, 0.0 }
 0x49b   : > { %v1019_v60 = vpop.f32.mrb[4].mxu1 }
 0x49c   : > { %v1973_v61 = vpop.f32.mrb[5].mxu1 }
 0x49f   : > { %v1100_v62 = vpop.f32.mrb[6].mxu1 }
 0x4a0   : > { %v1978_v63 = vpop.f32.mrb[7].mxu1  ;;  %v1104_v2 = vsel %vm864_vm2, %v1100_v62, -inf }
 0x4a1   : > { %1105 = vmax.xlane.f32.xlu1 %v1104_v2 }
 0x4b2   : > { %1456 = vrot.lane.b32.xlu1 %v863_v37, %s2655_s25 }
 0x4d6   : > { %1283 = vadd.xlane.f32.xlu1 %v1282_v5 }
 0x52e   : > { %v1106_v9 = vpop.xlane.xlu1 %1105 }
 0x52f   : > { %v1107_v10 = vsub.f32 %v1100_v62, %v1106_v9 }
 0x531   : > { %v1108_v12 = vmul.f32 1.442695, %v1107_v10 }
 0x532   : > { %v1457_v16 = vpop.permute.xlu1 %1456 }
 0x533   : > { %2207 = vpow2.f32 %v1108_v12 }
 0x534   : > { %2209 = vpow2.f32 %v1451_v11 }
 0x53d   : > { %v2208_v13 = vpop.eup %2207 }
 0x53e   : > { %1982 = vmatmul.mubr.msk.f32.vlgmr.msra.gmra.mrb[8].mxu1 %vm864_vm2, %v2208_v13  ;;  %v1110_v14 = vsel %vm864_vm2, %v2208_v13, 0.0  ;;  %v2210_v15 = vpop.eup %2209 }
 0x53f   : > { %1990 = vmatpush3.msra.mxu1 %v1286_v6  ;;  %1111 = vadd.xlane.f32.xlu0 %v1110_v14  ;;  %v1453_v17 = vsel %vm864_vm2, %v2210_v15, 0.0 }
 0x540   : > { %1991 = vmatprep.mubr.msk.f32.mxu1 %vm2651_vm0, %v2652_v1  ;;  %1999 = vmatprep.subr.mxu1 %v2652_v1 }
 0x542   : > { %1992 = vmatmul.mubr.msk.f32.vlgmr.msra.gmra.mrb[10].mxu1 %vm864_vm2, %v2206_v4 }
 0x543   : > { %2000 = vmatpush3.msra.mxu1 %v1457_v16  ;;  %1454 = vadd.xlane.f32.xlu0 %v1453_v17 }
 0x544   : > { %2001 = vmatprep.mubr.msk.f32.mxu1 %vm2651_vm0, %v2652_v1  ;;  %v2034_v1 = vpack.c.bf16 %v1542_v26, %v1541_v25 }
 0x546   : > { %2002 = vmatmul.mubr.msk.f32.vlgmr.msra.gmra.mrb[12].mxu1 %vm864_vm2, %v2210_v15  ;;  %2035 = vmatpush3.bf16.msra.mxu0 %v2034_v1 }
 0x547   : > { %948 = vadd.xlane.f32.xlu0 %v947_v18  ;;  %2036 = vmatprep.subr.bf16.mxu0 %v2650_v0 }
 0x54a   : > { %2038 = vmatpush3.bf16.msra.mxu0 %v2037_v31 }
 0x563   : > { %v1284_v24 = vpop.xlane.xlu1 %1283 }
 0x5cc   : > { %v1112_v19 = vpop.xlane.xlu0 %1111 }
 0x5d0   : > { %v1455_v20 = vpop.xlane.xlu0 %1454 }
 0x5d4   : > { %v949_v21 = vpop.xlane.xlu0 %948 }
 0x5d5   : > { %2211 = vrcp.f32 %v949_v21 }
 0x5d6   : > { %2213 = vrcp.f32 %v1112_v19 }
 0x5d7   : > { %2215 = vrcp.f32 %v1284_v24 }
 0x5d8   : > { %2217 = vrcp.f32 %v1455_v20 }
 0x5df   : > { %v2212_v22 = vpop.eup %2211 }
 0x5e0   : > { %v1024_v23 = vmul.f32 %v2212_v22, %v1019_v60  ;;  %v2214_v29 = vpop.eup %2213 }
 0x5e1   : > { %v2216_v34 = vpop.eup %2215 }
 0x5e2   : > { %1025 = vst.msk [vmem:[#allocation4] sm:$0xff] %vm864_vm2, %v1024_v23  ;;  %v2218_v38 = vpop.eup %2217 }
 0x611   : > { %v1186_v30 = vpop.f32.mrb[8].mxu1 }
 0x612   : > { %v1191_v32 = vmul.f32 %v2214_v29, %v1186_v30  ;;  %v1983_v33 = vpop.f32.mrb[9].mxu1 }
 0x614   : > { %1193 = vrot.lane.b32.xlu1 %v1191_v32, %s2656_s15 }
 0x615   : > { %v1357_v35 = vpop.f32.mrb[10].mxu1 }
 0x616   : > { %v1362_v36 = vmul.f32 %v2216_v34, %v1357_v35  ;;  %v1993_v37 = vpop.f32.mrb[11].mxu1 }
 0x618   : > { %1364 = vrot.lane.b32.xlu0 %v1362_v36, %s2657_s22 }
 0x619   : > { %v1528_v39 = vpop.f32.mrb[12].mxu1 }
 0x61a   : > { %v1533_v40 = vmul.f32 %v2218_v38, %v1528_v39  ;;  %v2003_v41 = vpop.f32.mrb[13].mxu1 }
 0x61c   : > { %1535 = vrot.lane.b32.xlu1 %v1533_v40, %s2658_s9 }
 0x686   : > { %v1194_v42 = vpop.permute.xlu1 %1193 }
 0x687   : > { %1197 = vst.msk [vmem:[#allocation4] sm:$0xff] %vm1196_vm3, %v1194_v42 }
 0x68a   : > { %v1365_v0 = vpop.permute.xlu0 %1364 }
 0x68b   : > { %1368 = vst.msk [vmem:[#allocation4] sm:$0xff] %vm1367_vm4, %v1365_v0 }
 0x68e   : > { %v1536_v43 = vpop.permute.xlu1 %1535 }
 0x68f   : > { %1539 = vst.msk [vmem:[#allocation4] sm:$0xff] %vm1538_vm5, %v1536_v43 }
 0x696   : > { %v1540_v44 = vld [vmem:[#allocation4] sm:$0xff] }
 0x697   : > { %2013 = vmatmul.mubr.msk.f32.vlgmr.msra.gmra.mrb[8].mxu0 %vm614_vm1, %v1540_v44 }
 0x76a   : > { %v1621_v46 = vpop.f32.mrb[8].mxu0 }
 0x76b   : > { %v1622_v47 = vadd.f32 %v1889_v45, %v1621_v46  ;;  %v2014_v48 = vpop.f32.mrb[9].mxu0 }
 0x76d   : > { %1625 = vst.msk [vmem:[%s597_s11] sm:$0xff] %vm614_vm1, %v1622_v47 }
 0x76e   : > { %2546 = shalt.err (!%p2543_p3)
}
 0x76f   : > { %s2547_s7 = scalar_lea.hbm %s3215_s2, 128  ;;  %s2551_s23 = scalar_lea.hbm %s3357_s28, 256 }
 0x770   : > { %p2548_p13 = scmp.ne.s32.totalorder %s3215_s2, %s2547_s7  ;;  %p2552_p8 = scmp.lt.u32.totalorder %s3215_s2, %s3357_s28 }
 0x771   : > { %p2553_p12 = scmp.lt.u32.totalorder %s2551_s23, %s2547_s7  ;;  %p2555_p9 = scmp.lt.u32.totalorder %s2547_s7, %s3215_s2 }
 0x772   : > { %p2549_p2 = pnand %p2548_p13, %p3358_p10 }
 0x773   : > { %p2554_p1 = por %p2553_p12, %p2552_p8 }
 0x774   : > { %p2550_p4 = pneg %p2549_p2 }
 0x775   : > { %p2556_p5 = por %p2555_p9, %p2554_p1 }
 0x777   : > { %p2557_p11 = pnand %p2556_p5, %p2550_p4 }
 0x779   : > { %2560 = shalt.err (!%p2557_p11)
}
 0x77a   : > { %2077 = dma.vmem_to_hbm [thread:$0]  (%p3358_p10), %s3217_s20, 128, %s3215_s2, %s1627_s12  }
 0x77b PF: > { %s3359_s15 = sld [smem:[#allocation37_spill]]  ;;  %s3360_s22 = sld [smem:[#allocation33_spill]] }
 0x77c   : > { %s1653_s3 = sand.u32 1, %s2615_s17  }
 0x77d   : > { %s1654_s9 = scalar_lea.sflag [#allocation7], %s1653_s3 }
 0x781   : > { %p3361_p0 = scmp.ne.s32.totalorder %s3359_s15, 0  ;;  %p3362_p6 = scmp.ge.s32.totalorder %s3360_s22, 2 }
 0x783   : > { %p2115_p7 = pnand %p3362_p6, %p3361_p0 }
 0x785   : > { %2610 = dma.done.wait (!%p2115_p7), %s1654_s9, 128  }
 0x786   : > { %2612 = vsyncadd (!%p2115_p7), %s1654_s9, 4294967168  ;;  %s34_s22 = sadd.s32 1, %s3360_s22   ;;  %s3363_s26 = sld [smem:[#allocation36_spill]] }
 0x787   : > { %p31_p3 = scmp.ge.s32.totalorder %s34_s22, 4   ;;  %s3364_s20 = sld [smem:[#allocation32_spill]] }
 0x788   : > { %s3365_s21 = sld [smem:[#allocation35_spill]]  ;;  %s3366_s17 = smov %s2619_s18 }
 0x789   : > { %s3367_s18 = smov %s2623_s19  ;;  %33 = sbr.rel (!%p31_p3) target bundleno = 22 (0x16), region = 169 }
 0x78c   : > { %s3368_s19 = smov %s3363_s26 }
 0x790   :  { %1659 = vsyncpa [#allocation6], 1 }
 0x791   :  { %1661 = vsyncpa [#allocation6 + $0x1], 1 }
 0x792   :  { %1662 = vsyncpa [#allocation9], 1 }
 0x793   :  { %1664 = vsyncpa [#allocation9 + $0x1], 1 }
 0x794   :  { %1665 = vsyncpa [#allocation12], 1 }
 0x795   :  { %1666 = vsyncpa [#allocation15], 1 }
 0x796   :  { %1667 = vsyncpa [#allocation18], 1 }
 0x797   :  { %1668 = vsyncpa [#allocation21], 1 }
 0x798   :  { %1669 = vsyncpa [#allocation7], 1 }
 0x799   :  { %1671 = vsyncpa [#allocation7 + $0x1], 1 }

</bundles_post_ra>
